<compile_context>
chip_gen: v5e
topology: v5e:2x2
jax: 0.10.0
libtpu: 0.0.40
codegen_flags: <defaults>
</compile_context>

<pallas_src>
import math
from functools import partial

import numpy as np
import jax
import jax.numpy as jnp
from jax.experimental import pallas as pl
from jax.experimental.pallas import tpu as pltpu

_TM = 512                        # max row tile (sublane axis) for matmul kernels
_VMEM_LIMIT = 56 * 1024 * 1024   # explicit scoped-VMEM budget; fits v7x's 64 MiB


def _round_up(x, m):
    return (x + m - 1) // m * m


def _pick_tm(M):
    """Row tile: aim for >=2 grid steps (megacore on v7x) while capping VMEM."""
    if M <= 16:
        return M
    return min(_TM, _round_up((M + 1) // 2, 8))


def _cparams(*sems):
    return pltpu.CompilerParams(dimension_semantics=sems,
                                vmem_limit_bytes=_VMEM_LIMIT)


# ----------------------------------------------------------------------------
# Pallas kernels
# ----------------------------------------------------------------------------
def _apply_act(y, epilogue):
    if epilogue == "lrelu":
        return jnp.where(y >= 0, y, 0.01 * y)
    return y


def _gdn_of(y, gamma_t, beta, inverse):
    # norm_i = beta_i + sum_j gamma[i, j] * y_j^2  (fp32 y^2, fp32 gamma matmul)
    norm = jnp.dot(y * y, gamma_t, preferred_element_type=jnp.float32) + beta
    norm = jnp.maximum(norm, 1e-6)   # keeps rsqrt finite on masked/ragged rows
    return y * (jnp.sqrt(norm) if inverse else jax.lax.rsqrt(norm))


def _mm_kernel(a_ref, b_ref, bias_ref, o_ref, *, epilogue):
    y = jnp.dot(a_ref[...], b_ref[...], preferred_element_type=jnp.float32)
    o_ref[...] = _apply_act(y + bias_ref[...], epilogue).astype(o_ref.dtype)


def _mm_gdn_kernel(a_ref, b_ref, bias_ref, g_ref, beta_ref, o_ref, *, inverse):
    y = (jnp.dot(a_ref[...], b_ref[...], preferred_element_type=jnp.float32)
         + bias_ref[...])
    o_ref[...] = _gdn_of(y, g_ref[...], beta_ref[...], inverse).astype(o_ref.dtype)


def matmul_fused(a, b, bias, *, epilogue="none", gdn_params=None,
                 out_dtype=jnp.bfloat16):
    """(M,K)@(K,N) + bias with an optional fused LeakyReLU / (I)GDN epilogue.

    The whole (K,N) weight stays resident in VMEM (constant index_map), so it
    is DMA'd once instead of per M tile; accumulation is fp32 inside one MXU
    dot (no K grid, no scratch accumulator)."""
    a = a.astype(jnp.bfloat16)
    b = b.astype(jnp.bfloat16)
    M, K = a.shape
    K2, N = b.shape
    assert K == K2
    tm = _pick_tm(M)
    grid = (pl.cdiv(M, tm),)
    a_spec = pl.BlockSpec((tm, K), lambda i: (i, 0))
    b_spec = pl.BlockSpec((K, N), lambda i: (0, 0))
    vec_spec = pl.BlockSpec((1, N), lambda i: (0, 0))
    out_spec = pl.BlockSpec((tm, N), lambda i: (i, 0))
    bias2 = jnp.asarray(bias, jnp.float32).reshape(1, N)

    if gdn_params is None:
        return pl.pallas_call(
            partial(_mm_kernel, epilogue=epilogue),
            out_shape=jax.ShapeDtypeStruct((M, N), out_dtype),
            grid=grid,
            in_specs=[a_spec, b_spec, vec_spec],
            out_specs=out_spec,
            compiler_params=_cparams("parallel"),
        )(a, b, bias2)

    gamma_t, beta, inverse = gdn_params
    return pl.pallas_call(
        partial(_mm_gdn_kernel, inverse=inverse),
        out_shape=jax.ShapeDtypeStruct((M, N), out_dtype),
        grid=grid,
        in_specs=[a_spec, b_spec, vec_spec,
                  pl.BlockSpec((N, N), lambda i: (0, 0)),
                  vec_spec],
        out_specs=out_spec,
        compiler_params=_cparams("parallel"),
    )(a, b, bias2,
      jnp.asarray(gamma_t, jnp.float32),
      jnp.asarray(beta, jnp.float32).reshape(1, N))


def _gdn_kernel(x_ref, g_ref, b_ref, o_ref, *, inverse):
    o_ref[...] = _gdn_of(x_ref[...], g_ref[...], b_ref[...], inverse).astype(o_ref.dtype)


def gdn(x, gamma, beta, inverse=False, out_dtype=jnp.bfloat16):
    """Standalone (I)GDN on an NHWC tensor (only where it cannot be fused)."""
    B, H, W_, C = x.shape
    rows = x.reshape(-1, C).astype(jnp.float32)
    M = rows.shape[0]
    tm = _pick_tm(M)
    out = pl.pallas_call(
        partial(_gdn_kernel, inverse=inverse),
        out_shape=jax.ShapeDtypeStruct((M, C), out_dtype),
        grid=(pl.cdiv(M, tm),),
        in_specs=[pl.BlockSpec((tm, C), lambda i: (i, 0)),
                  pl.BlockSpec((C, C), lambda i: (0, 0)),
                  pl.BlockSpec((1, C), lambda i: (0, 0))],
        out_specs=pl.BlockSpec((tm, C), lambda i: (i, 0)),
        compiler_params=_cparams("parallel"),
    )(rows, jnp.asarray(gamma.T, jnp.float32),
      jnp.asarray(beta, jnp.float32).reshape(1, C))
    return out.reshape(B, H, W_, C)


def _mlp3_kernel(x_ref, w1_ref, b1_ref, w2_ref, b2_ref, w3_ref, b3_ref, o_ref):
    """entropy_parameters: three fused 1x1 convs with LeakyReLU in between;
    all weights resident in VMEM, intermediates never touch HBM."""
    h = jnp.dot(x_ref[...], w1_ref[...], preferred_element_type=jnp.float32) + b1_ref[...]
    h = jnp.where(h >= 0, h, 0.01 * h)
    h = jnp.dot(h.astype(jnp.bfloat16), w2_ref[...],
                preferred_element_type=jnp.float32) + b2_ref[...]
    h = jnp.where(h >= 0, h, 0.01 * h)
    h = jnp.dot(h.astype(jnp.bfloat16), w3_ref[...],
                preferred_element_type=jnp.float32) + b3_ref[...]
    o_ref[...] = h.astype(o_ref.dtype)


def entropy_parameters_fused(x, eps):
    """x: NHWC; eps: list of three 1x1-conv params.  Output fp32."""
    B, H, W_, C = x.shape
    rows = x.reshape(-1, C).astype(jnp.bfloat16)
    M = rows.shape[0]
    ws = [jnp.transpose(p["w"][:, :, 0, 0], (1, 0)).astype(jnp.bfloat16) for p in eps]
    bs = [jnp.asarray(p["b"], jnp.float32).reshape(1, -1) for p in eps]
    c_out = ws[2].shape[1]
    tm = _pick_tm(M)
    out = pl.pallas_call(
        _mlp3_kernel,
        out_shape=jax.ShapeDtypeStruct((M, c_out), jnp.float32),
        grid=(pl.cdiv(M, tm),),
        in_specs=[pl.BlockSpec((tm, C), lambda i: (i, 0)),
                  pl.BlockSpec(ws[0].shape, lambda i: (0, 0)),
                  pl.BlockSpec(bs[0].shape, lambda i: (0, 0)),
                  pl.BlockSpec(ws[1].shape, lambda i: (0, 0)),
                  pl.BlockSpec(bs[1].shape, lambda i: (0, 0)),
                  pl.BlockSpec(ws[2].shape, lambda i: (0, 0)),
                  pl.BlockSpec(bs[2].shape, lambda i: (0, 0))],
        out_specs=pl.BlockSpec((tm, c_out), lambda i: (i, 0)),
        compiler_params=_cparams("parallel"),
    )(rows, ws[0], bs[0], ws[1], bs[1], ws[2], bs[2])
    return out.reshape(B, H, W_, c_out)


def _attn_kernel(kv_ref, q_ref, wr_ref, br_ref, o_ref, *, head_count, hk, hv, ck):
    """EfficientAttention for one sample: key/value split, per-head softmaxes,
    context, attended values and the output re-projection - all fused."""
    kv = kv_ref[0]                             # (HW, ck+cv) bf16
    k_all = kv[:, :ck].astype(jnp.float32)
    v_all = kv[:, ck:]                         # bf16
    q_all = q_ref[0].astype(jnp.float32)       # (HW, ck)
    out = None
    for h in range(head_count):
        kh_ = k_all[:, h * hk:(h + 1) * hk]
        qh_ = q_all[:, h * hk:(h + 1) * hk]
        vh_ = v_all[:, h * hv:(h + 1) * hv]
        # key softmax over spatial positions, query softmax over head channels
        kh_ = jnp.exp(kh_ - jnp.max(kh_, axis=0, keepdims=True))
        kh_ = kh_ / jnp.sum(kh_, axis=0, keepdims=True)
        qh_ = jnp.exp(qh_ - jnp.max(qh_, axis=1, keepdims=True))
        qh_ = qh_ / jnp.sum(qh_, axis=1, keepdims=True)
        # context (hk, hv) = k^T @ v  (contraction over HW on the MXU)
        ctx = jax.lax.dot_general(kh_.astype(jnp.bfloat16), vh_,
                                  dimension_numbers=(((0,), (0,)), ((), ())),
                                  preferred_element_type=jnp.float32)
        att = jnp.dot(qh_.astype(jnp.bfloat16), ctx.astype(jnp.bfloat16),
                      preferred_element_type=jnp.float32)        # (HW, hv)
        term = jnp.dot(att.astype(jnp.bfloat16),
                       wr_ref[h * hv:(h + 1) * hv, :],
                       preferred_element_type=jnp.float32)        # (HW, cq)
        out = term if out is None else out + term
    o_ref[0] = (out + br_ref[...]).astype(o_ref.dtype)


def wb(p):
    return p["w"], p["b"]


# ----------------------------------------------------------------------------
# Conv / deconv built on the fused Pallas matmul (im2col in plain JAX = glue)
# ----------------------------------------------------------------------------
def conv2d(x, w, b, stride=1, padding=0, epilogue="none", gdn_params=None,
           out_dtype=jnp.bfloat16):
    """x: NHWC; w: (Cout, Cin, kh, kw) (torch layout)."""
    B, H, W_, Cin = x.shape
    Cout, _, kh, kw = w.shape
    Ho = (H + 2 * padding - kh) // stride + 1
    Wo = (W_ + 2 * padding - kw) // stride + 1
    xb = x.astype(jnp.bfloat16)
    if padding > 0:
        xb = jnp.pad(xb, ((0, 0), (padding, padding), (padding, padding), (0, 0)))
    if kh == 1 and kw == 1 and stride == 1:
        a = xb.reshape(B * Ho * Wo, Cin)
    else:
        # TODO(synk): im2col still materialized in HBM (k^2 duplication).
        patches = [xb[:, ki:ki + stride * Ho:stride, kj:kj + stride * Wo:stride, :]
                   for ki in range(kh) for kj in range(kw)]
        a = jnp.stack(patches, axis=3).reshape(B * Ho * Wo, kh * kw * Cin)
    wmat = jnp.transpose(w, (2, 3, 1, 0)).reshape(kh * kw * Cin, Cout)
    out = matmul_fused(a, wmat, b, epilogue=epilogue, gdn_params=gdn_params,
                       out_dtype=out_dtype)
    return out.reshape(B, Ho, Wo, Cout)


def _deconv_phase_taps(phase, stride, padding, k):
    """Input offsets d and kernel taps kk with: out[s*r+phase] += x[r+d]*w[kk]."""
    taps = []
    for d in range(-(k // stride) - 1, k // stride + 2):
        kk = phase + padding - stride * d
        if 0 <= kk < k:
            taps.append((d, kk))
    return taps


def conv_transpose2d(x, w, b, stride=2, padding=2, output_padding=1,
                     epilogue="none", gdn_params=None, out_dtype=jnp.bfloat16):
    """Sub-pixel (phase) decomposition of ConvTranspose2d with all stride^2
    phases fused into a single matmul (shared union-tap im2col, weights stacked
    along N -> lane-dense output), followed by one pixel shuffle.
    x: NHWC; w: (Cin, Cout, kh, kw) (torch ConvTranspose2d layout)."""
    B, H, W_, Cin = x.shape
    _, Cout, kh, kw = w.shape
    s = stride
    assert (H - 1) * s - 2 * padding + kh + output_padding == s * H, \
        "phase decomposition assumes output size == stride * input size"
    assert (W_ - 1) * s - 2 * padding + kw + output_padding == s * W_

    row_taps = [_deconv_phase_taps(p, s, padding, kh) for p in range(s)]
    col_taps = [_deconv_phase_taps(q, s, padding, kw) for q in range(s)]
    dr_set = sorted({d for taps in row_taps for d, _ in taps})
    dc_set = sorted({d for taps in col_taps for d, _ in taps})
    pad_t, pad_b = max(0, -min(dr_set)), max(0, max(dr_set))
    pad_l, pad_r = max(0, -min(dc_set)), max(0, max(dc_set))
    xp = jnp.pad(x.astype(jnp.bfloat16),
                 ((0, 0), (pad_t, pad_b), (pad_l, pad_r), (0, 0)))

    # one union-tap im2col shared by all phases
    patches = [xp[:, dr + pad_t:dr + pad_t + H, dc + pad_l:dc + pad_l + W_, :]
               for dr in dr_set for dc in dc_set]
    ntaps = len(patches)
    a = jnp.stack(patches, axis=3).reshape(B * H * W_, ntaps * Cin)

    # phase weights stacked along the output column axis (s*s*Cout columns)
    cols = []
    for p in range(s):
        rt = dict(row_taps[p])
        for q in range(s):
            ct = dict(col_taps[q])
            blocks = []
            for dr in dr_set:
                for dc in dc_set:
                    if dr in rt and dc in ct:
                        blocks.append(w[:, :, rt[dr], ct[dc]])       # (Cin, Cout)
                    else:
                        blocks.append(jnp.zeros((Cin, Cout), w.dtype))
            cols.append(jnp.concatenate(blocks, axis=0))             # (ntaps*Cin, Cout)
    wmat = jnp.concatenate(cols, axis=1)                             # (ntaps*Cin, s*s*Cout)
    bias_big = jnp.tile(jnp.asarray(b, jnp.float32), s * s)

    gdn_big = None
    if gdn_params is not None:
        gamma_t, beta, inverse = gdn_params
        gbd = jnp.kron(jnp.eye(s * s, dtype=jnp.float32),
                       jnp.asarray(gamma_t, jnp.float32))            # block-diagonal
        beta_big = jnp.tile(jnp.asarray(beta, jnp.float32), s * s)
        gdn_big = (gbd, beta_big, inverse)

    out = matmul_fused(a, wmat, bias_big, epilogue=epilogue, gdn_params=gdn_big,
                       out_dtype=out_dtype)
    # pixel shuffle: out[:, s*r+p, s*c+q, :] = res[:, r, c, (p*s+q)*Cout + :]
    out = (out.reshape(B, H, W_, s, s, Cout)
              .transpose(0, 1, 3, 2, 4, 5)
              .reshape(B, s * H, s * W_, Cout))
    return out


# ----------------------------------------------------------------------------
# Parameter initialization (deterministic, synthetic)
# ----------------------------------------------------------------------------
class KeyGen:
    def __init__(self, seed):
        self._key = jax.random.PRNGKey(seed)

    def __call__(self):
        self._key, sub = jax.random.split(self._key)
        return sub


def conv_init(kg, cout, cin, k):
    fan_in = cin * k * k
    return {"w": jax.random.normal(kg(), (cout, cin, k, k), jnp.float32) / math.sqrt(fan_in),
            "b": 0.01 * jax.random.normal(kg(), (cout,), jnp.float32)}


def deconv_init(kg, cin, cout, k):
    fan_in = cin * k * k
    return {"w": jax.random.normal(kg(), (cin, cout, k, k), jnp.float32) / math.sqrt(fan_in),
            "b": 0.01 * jax.random.normal(kg(), (cout,), jnp.float32)}


def gdn_init(C):
    return {"gamma": 0.1 * jnp.eye(C, dtype=jnp.float32),
            "beta": jnp.ones((C,), jnp.float32)}


def resblock_init(kg, cin, cout):
    p = {"conv1": conv_init(kg, cout, cin, 3), "conv2": conv_init(kg, cout, cout, 3)}
    if cin != cout:
        p["skip"] = conv_init(kg, cout, cin, 1)
    return p


def resblock(x, p):
    out = conv2d(x, *wb(p["conv1"]), stride=1, padding=1, epilogue="lrelu")
    out = conv2d(out, *wb(p["conv2"]), stride=1, padding=1, epilogue="lrelu")
    identity = conv2d(x, *wb(p["skip"])) if "skip" in p else x
    return out + identity


def eff_attn_init(kg, key_in, query_in, key_ch, head_count, value_ch):
    return {"keys": conv_init(kg, key_ch, key_in, 1),
            "queries": conv_init(kg, key_ch, query_in, 1),
            "values": conv_init(kg, value_ch, key_in, 1),
            "reproj": conv_init(kg, query_in, value_ch, 1),
            "head_count": head_count, "key_channels": key_ch, "value_channels": value_ch}


def eff_attn(target, inp, p):
    """EfficientAttention: fused keys+values projection (one A read), then a
    single kernel doing head split, softmaxes, context, and re-projection."""
    n, h, w, _ = inp.shape
    ck, cv, hc = p["key_channels"], p["value_channels"], p["head_count"]
    hk, hv = ck // hc, cv // hc

    kv_w = jnp.concatenate([p["keys"]["w"], p["values"]["w"]], axis=0)
    kv_b = jnp.concatenate([p["keys"]["b"], p["values"]["b"]], axis=0)
    kv = conv2d(inp, kv_w, kv_b).reshape(n, h * w, ck + cv)          # bf16
    q = conv2d(target, *wb(p["queries"])).reshape(n, h * w, ck)      # bf16

    wr = jnp.transpose(p["reproj"]["w"][:, :, 0, 0], (1, 0)).astype(jnp.bfloat16)
    br = jnp.asarray(p["reproj"]["b"], jnp.float32).reshape(1, -1)
    cq = wr.shape[1]
    hw = h * w

    out = pl.pallas_call(
        partial(_attn_kernel, head_count=hc, hk=hk, hv=hv, ck=ck),
        out_shape=jax.ShapeDtypeStruct((n, hw, cq), jnp.bfloat16),
        grid=(n,),
        in_specs=[pl.BlockSpec((1, hw, ck + cv), lambda i: (i, 0, 0)),
                  pl.BlockSpec((1, hw, ck), lambda i: (i, 0, 0)),
                  pl.BlockSpec((cv, cq), lambda i: (0, 0)),
                  pl.BlockSpec((1, cq), lambda i: (0, 0))],
        out_specs=pl.BlockSpec((1, hw, cq), lambda i: (i, 0, 0)),
        compiler_params=_cparams("parallel"),
    )(kv, q, wr, br)
    return out.reshape(n, h, w, cq)


def mjct_init(kg, channels):
    return {"rb": [resblock_init(kg, channels, channels),
                   resblock_init(kg, channels, channels)],
            "attn": eff_attn_init(kg, channels, channels, channels // 8, 2, channels // 4),
            "refine": [resblock_init(kg, channels * 2, channels),
                       resblock_init(kg, channels, channels)]}


def mjct(x, num_camera, p):
    """Multi_JointContextTransfer; all cameras processed in one batched pass
    (per-sample ops are batch-independent, so this is exactly equivalent to the
    reference per-camera loop but with half the kernel launches)."""
    rb_x = resblock(resblock(x, p["rb"][0]), p["rb"][1])
    rb_list = jnp.split(rb_x, num_camera, axis=0)
    aggs = []
    for idx in range(num_camera):
        others = [r for i, r in enumerate(rb_list) if i != idx]
        aggs.append(jnp.mean(jnp.stack(others, axis=0), axis=0))  # AdaptiveAvgPool3d
    agg_all = jnp.concatenate(aggs, axis=0)
    a_all = eff_attn(rb_x, agg_all, p["attn"])
    ref = resblock(resblock(jnp.concatenate([a_all, rb_x], axis=-1),
                            p["refine"][0]), p["refine"][1])
    return x + ref


# ---------------- entropy models (small compute; plain JAX glue) -------------
def entropy_bottleneck_init(kg, channels, filters=(3, 3, 3), init_scale=10.0):
    f = (1,) + filters + (1,)
    scale = init_scale ** (1.0 / (len(filters) + 1))
    mats, biases, factors = [], [], []
    for i in range(len(filters) + 1):
        init = math.log(math.expm1(1.0 / scale / f[i + 1]))
        mats.append(jnp.full((channels, f[i + 1], f[i]), init, jnp.float32))
        biases.append(jax.random.uniform(kg(), (channels, f[i + 1], 1), jnp.float32, -0.5, 0.5))
        if i < len(filters):
            factors.append(jnp.zeros((channels, f[i + 1], 1), jnp.float32))
    return {"matrices": mats, "biases": biases, "factors": factors}


def _eb_logits_cumulative(v, p):
    logits = v
    for i in range(len(p["matrices"])):
        m = jax.nn.softplus(p["matrices"][i])
        logits = jnp.einsum("cij,cjl->cil", m, logits) + p["biases"][i]
        if i < len(p["factors"]):
            logits = logits + jnp.tanh(p["factors"][i]) * jnp.tanh(logits)
    return logits


def entropy_bottleneck(z, p):
    B, H, W_, C = z.shape
    z_hat = jnp.round(z)  # eval mode; medians == 0 at this synthetic init
    v = z_hat.reshape(-1, C).T.reshape(C, 1, -1)
    lower = _eb_logits_cumulative(v - 0.5, p)
    upper = _eb_logits_cumulative(v + 0.5, p)
    sign = -jnp.sign(lower + upper)
    lik = jnp.abs(jax.nn.sigmoid(sign * upper) - jax.nn.sigmoid(sign * lower))
    lik = jnp.maximum(lik, 1e-9)
    return z_hat, lik.reshape(C, B, H, W_).transpose(1, 2, 3, 0)


def _std_cumulative(x):
    return 0.5 * (1.0 + jax.lax.erf(x * (2.0 ** -0.5)))


def gaussian_conditional(y, scales, means):
    outputs = jnp.round(y - means) + means          # eval-mode quantize("dequantize")
    scales = jnp.maximum(scales, 0.11)              # lower_bound_scale
    values = jnp.abs(outputs - means)
    upper = _std_cumulative((0.5 - values) / scales)
    lower = _std_cumulative((-0.5 - values) / scales)
    return outputs, jnp.maximum(upper - lower, 1e-9)


def masked_conv_init(kg, cin, cout, k):
    p = conv_init(kg, cout, cin, k)
    mask = jnp.ones((k, k), jnp.float32)
    mask = mask.at[k // 2, k // 2:].set(0.0)
    mask = mask.at[k // 2 + 1:, :].set(0.0)
    p["w"] = p["w"] * mask[None, None]
    return p


def hyperprior_init(kg, in_planes, mid_planes, out_planes):
    return {"he": [conv_init(kg, mid_planes, in_planes, 3),
                   conv_init(kg, mid_planes, mid_planes, 5),
                   conv_init(kg, mid_planes, mid_planes, 5)],
            "hd": [deconv_init(kg, mid_planes, mid_planes, 5),
                   deconv_init(kg, mid_planes, mid_planes * 3 // 2, 5),
                   conv_init(kg, out_planes, mid_planes * 3 // 2, 3)],
            "eb": entropy_bottleneck_init(kg, mid_planes)}


def hyperprior(y, p):
    z = conv2d(y, *wb(p["he"][0]), stride=1, padding=1, epilogue="lrelu")
    z = conv2d(z, *wb(p["he"][1]), stride=2, padding=2, epilogue="lrelu")
    z = conv2d(z, *wb(p["he"][2]), stride=2, padding=2, out_dtype=jnp.float32)
    z_hat, z_lik = entropy_bottleneck(z, p["eb"])
    par = conv_transpose2d(z_hat, *wb(p["hd"][0]), stride=2, padding=2,
                           output_padding=1, epilogue="lrelu")
    par = conv_transpose2d(par, *wb(p["hd"][1]), stride=2, padding=2,
                           output_padding=1, epilogue="lrelu")
    par = conv2d(par, *wb(p["hd"][2]), stride=1, padding=1)
    return par, z_lik


# ----------------------------------------------------------------------------
# Multi_VBMIC
# ----------------------------------------------------------------------------
def multi_vbmic_init(kg, N=32, M=32):
    assert N == M, "forward path requires N == M (GDN(N) applied to M channels)"
    return {
        "encoder": {"convs": [conv_init(kg, N, 3, 5), conv_init(kg, N, N, 5),
                              conv_init(kg, N, N, 5), conv_init(kg, M, N, 5)],
                    "gdns": [gdn_init(N) for _ in range(4)]},
        "atten_3": mjct_init(kg, M),
        "decoder_1": {"gdns": [gdn_init(N) for _ in range(3)],
                      "deconvs": [deconv_init(kg, M, N, 5), deconv_init(kg, N, N, 5)]},
        "atten_4": mjct_init(kg, N),
        "decoder_2": {"deconvs": [deconv_init(kg, N, N, 5), deconv_init(kg, N, 3, 5)],
                      "gdns": [gdn_init(N)]},
        "hyperprior": hyperprior_init(kg, M, N, 2 * M),
        "context_prediction": masked_conv_init(kg, M, 2 * M, 5),
        "entropy_parameters": [conv_init(kg, M * 10 // 3, M * 12 // 3, 1),
                               conv_init(kg, M * 8 // 3, M * 10 // 3, 1),
                               conv_init(kg, M * 6 // 3, M * 8 // 3, 1)],
    }


def multi_vbmic_forward(x_list, p):
    num_camera = len(x_list)
    x = jnp.concatenate(x_list, axis=0)      # NCHW (PyTorch convention)
    x = jnp.transpose(x, (0, 2, 3, 1))       # -> NHWC once for the whole network

    # encoder: 4 x (conv k5 s2 with fused GDN epilogue); y kept fp32 (likelihoods)
    e = p["encoder"]
    y = x
    for i in range(4):
        g = e["gdns"][i]
        y = conv2d(y, *wb(e["convs"][i]), stride=2, padding=2,
                   gdn_params=(g["gamma"].T, g["beta"], False),
                   out_dtype=jnp.float32 if i == 3 else jnp.bfloat16)

    params_, z_lik = hyperprior(y, p["hyperprior"])
    y_hat = jnp.round(y)  # gaussian_conditional.quantize(y, "dequantize")
    ctx = conv2d(y_hat, *wb(p["context_prediction"]), stride=1, padding=2)
    gp = entropy_parameters_fused(jnp.concatenate([params_, ctx], axis=-1),
                                  p["entropy_parameters"])
    means_hat, scales_hat = jnp.split(gp, 2, axis=-1)
    _, y_lik = gaussian_conditional(y, scales_hat, means_hat)
    y_ste = jnp.round(y - means_hat) + means_hat  # quantize_ste forward value

    # decoder_1: atten_3 -> IGDN, deconv(+IGDN), deconv(+IGDN)
    d1 = p["decoder_1"]
    t = mjct(y_ste, num_camera, p["atten_3"])
    t = gdn(t, d1["gdns"][0]["gamma"], d1["gdns"][0]["beta"], inverse=True)
    t = conv_transpose2d(t, *wb(d1["deconvs"][0]), stride=2, padding=2, output_padding=1,
                         gdn_params=(d1["gdns"][1]["gamma"].T, d1["gdns"][1]["beta"], True))
    t = conv_transpose2d(t, *wb(d1["deconvs"][1]), stride=2, padding=2, output_padding=1,
                         gdn_params=(d1["gdns"][2]["gamma"].T, d1["gdns"][2]["beta"], True))

    # decoder_2: atten_4 -> deconv(+IGDN), deconv
    d2 = p["decoder_2"]
    t = mjct(t, num_camera, p["atten_4"])
    t = conv_transpose2d(t, *wb(d2["deconvs"][0]), stride=2, padding=2, output_padding=1,
                         gdn_params=(d2["gdns"][0]["gamma"].T, d2["gdns"][0]["beta"], True))
    x_hat = conv_transpose2d(t, *wb(d2["deconvs"][1]), stride=2, padding=2,
                             output_padding=1, out_dtype=jnp.float32)

    # back to NCHW only at the boundary
    x_hat = jnp.transpose(x_hat, (0, 3, 1, 2))
    y_lik = jnp.transpose(y_lik, (0, 3, 1, 2))
    z_lik = jnp.transpose(z_lik, (0, 3, 1, 2))

    x_hat_list = jnp.split(x_hat, num_camera, axis=0)
    z_list = jnp.split(z_lik, num_camera, axis=0)
    y_list = jnp.split(y_lik, num_camera, axis=0)
    likelihoods = [{"y": yl, "z": zl} for yl, zl in zip(y_list, z_list)]
    return {"x_hat": x_hat_list, "likelihoods": likelihoods}


# ----------------------------------------------------------------------------
# Pure references for self-tests
# ----------------------------------------------------------------------------
def _ref_deconv_np(x, w, b, stride, padding, output_padding):
    x = np.asarray(x, np.float64)
    w = np.asarray(w, np.float64)
    Bn, H, Wd, Cin = x.shape
    _, Cout, kh, kw = w.shape
    Ho = (H - 1) * stride - 2 * padding + kh + output_padding
    Wo = (Wd - 1) * stride - 2 * padding + kw + output_padding
    out = np.tile(np.asarray(b, np.float64), (Bn, Ho, Wo, 1)).copy()
    for n in range(Bn):
        for ih in range(H):
            for iw in range(Wd):
                for ki in range(kh):
                    for kj in range(kw):
                        oh = ih * stride - padding + ki
                        ow = iw * stride - padding + kj
                        if 0 <= oh < Ho and 0 <= ow < Wo:
                            out[n, oh, ow, :] += x[n, ih, iw, :] @ w[:, :, ki, kj]
    return out


def _ref_eff_attn(target, inp, p):
    n, h, w, _ = inp.shape
    ck, cv, hc = p["key_channels"], p["value_channels"], p["head_count"]

    def conv1x1(x, prm):
        return jnp.einsum("nhwc,oc->nhwo", x, prm["w"][:, :, 0, 0]) + prm["b"]

    keys = conv1x1(inp, p["keys"]).reshape(n, h * w, ck)
    queries = conv1x1(target, p["queries"]).reshape(n, h * w, ck)
    values = conv1x1(inp, p["values"]).reshape(n, h * w, cv)
    hk, hv = ck // hc, cv // hc
    heads = []
    for i in range(hc):
        k = jax.nn.softmax(keys[:, :, i * hk:(i + 1) * hk], axis=1)
        q = jax.nn.softmax(queries[:, :, i * hk:(i + 1) * hk], axis=2)
        v = values[:, :, i * hv:(i + 1) * hv]
        ctx = jnp.einsum("nsk,nsv->nkv", k, v)
        heads.append(jnp.einsum("nsk,nkv->nsv", q, ctx))
    agg = jnp.concatenate(heads, axis=-1)
    out = jnp.einsum("nsv,ov->nso", agg, p["reproj"]["w"][:, :, 0, 0]) + p["reproj"]["b"]
    return out.reshape(n, h, w, -1)


if __name__ == "__main__":
    N = M = 32          # small channel counts (module default is 128/192)
    H = W = 64          # smallest spatial size consistent with the hyperprior
    num_camera = 2

    # ---- unit self-tests of the Pallas building blocks (tiny shapes) --------
    kt = jax.random.PRNGKey(42)
    k1, k2, k3, k4, k5 = jax.random.split(kt, 5)

    # 1) fused matmul (ragged M, resident weight) vs XLA bf16 dot
    A = jax.random.normal(k1, (200, 384), jnp.float32)
    Bm = jax.random.normal(k2, (384, 96), jnp.float32)
    bias = jax.random.normal(k3, (96,), jnp.float32)
    got = matmul_fused(A, Bm, bias, out_dtype=jnp.float32)
    ref = jnp.dot(A.astype(jnp.bfloat16), Bm.astype(jnp.bfloat16),
                  preferred_element_type=jnp.float32) + bias
    err = float(jnp.max(jnp.abs(got - ref)) / (jnp.max(jnp.abs(ref)) + 1e-6))
    assert err < 5e-3, f"matmul mismatch: {err}"

    # 2) conv2d (im2col + fused matmul) vs fp32 lax reference
    xc = jax.random.normal(k1, (1, 8, 8, 8), jnp.float32)
    wc = jax.random.normal(k2, (16, 8, 5, 5), jnp.float32) * 0.1
    bc = jax.random.normal(k3, (16,), jnp.float32) * 0.1
    got = conv2d(xc, wc, bc, stride=2, padding=2, out_dtype=jnp.float32)
    ref = jax.lax.conv_general_dilated(
        xc, wc, window_strides=(2, 2), padding=[(2, 2), (2, 2)],
        dimension_numbers=("NHWC", "OIHW", "NHWC")) + bc
    err = float(jnp.max(jnp.abs(got - ref)) / (jnp.max(jnp.abs(ref)) + 1e-6))
    assert err < 2e-2, f"conv2d mismatch: {err}"

    # 3) fused-phase conv_transpose2d vs numpy loop reference
    xd = jax.random.normal(k2, (1, 4, 4, 8), jnp.float32)
    wd = jax.random.normal(k3, (8, 16, 5, 5), jnp.float32) * 0.1
    bd = jax.random.normal(k4, (16,), jnp.float32) * 0.1
    got = conv_transpose2d(xd, wd, bd, stride=2, padding=2, output_padding=1,
                           out_dtype=jnp.float32)
    refd = _ref_deconv_np(xd, wd, bd, 2, 2, 1)
    err = float(np.max(np.abs(np.asarray(got, np.float64) - refd))
                / (np.max(np.abs(refd)) + 1e-6))
    assert err < 2e-2, f"deconv mismatch: {err}"

    # 4) fused attention kernel (projections + heads + reprojection) vs jnp ref
    kg_t = KeyGen(7)
    p_attn = eff_attn_init(kg_t, 32, 32, 4, 2, 8)
    tgt = jax.random.normal(k4, (2, 4, 4, 32), jnp.float32)
    src = jax.random.normal(k5, (2, 4, 4, 32), jnp.float32)
    got = eff_attn(tgt, src, p_attn).astype(jnp.float32)
    refa = _ref_eff_attn(tgt, src, p_attn)
    err = float(jnp.max(jnp.abs(got - refa)) / (jnp.max(jnp.abs(refa)) + 1e-6))
    assert err < 5e-2, f"attention mismatch: {err}"

    # ---- end-to-end forward ---------------------------------------------------
    in_key = jax.random.PRNGKey(0)
    ka, kb = jax.random.split(in_key)
    x_list = [jax.random.uniform(ka, (1, 3, H, W), jnp.float32),
              jax.random.uniform(kb, (1, 3, H, W), jnp.float32)]

    kg = KeyGen(1)
    params = multi_vbmic_init(kg, N=N, M=M)

    forward_fn = jax.jit(lambda xs: multi_vbmic_forward(xs, params))
    out = jax.block_until_ready(forward_fn(x_list))

    assert out["x_hat"][0].shape == (1, 3, H, W)
    assert out["likelihoods"][0]["y"].shape == (1, M, H // 16, W // 16)
    assert out["likelihoods"][0]["z"].shape == (1, N, H // 64, W // 64)
    assert len(out["x_hat"]) == num_camera and len(out["likelihoods"]) == num_camera
    assert all(bool(jnp.all(jnp.isfinite(t))) for t in out["x_hat"])
    print("KERNEL_OK")
</pallas_src>

<mosaic_0001>
module attributes {stable_mosaic.version = 11 : i64} {
  func.func @_mm_kernel(%arg0: i32, %arg1: memref<104x384xbf16, #tpu.memory_space<vmem>>, %arg2: memref<384x96xbf16, #tpu.memory_space<vmem>>, %arg3: memref<1x96xf32, #tpu.memory_space<vmem>>, %arg4: memref<104x96xf32, #tpu.memory_space<vmem>>) attributes {dimension_semantics = [#tpu.dimension_semantics<parallel>], iteration_bounds = array<i64: 2>, scalar_prefetch = 0 : i64, scratch_operands = 0 : i64, tpu.core_type = #tpu.core_type<tc>, window_params = [{transform_indices = @transform_0, window_bounds = array<i64: 104, 384>}, {pipeline_mode = #tpu.pipeline_mode<synchronous>, transform_indices = @transform_1, window_bounds = array<i64: 384, 96>}, {pipeline_mode = #tpu.pipeline_mode<synchronous>, transform_indices = @transform_2, window_bounds = array<i64: 1, 96>}, {transform_indices = @transform_3, window_bounds = array<i64: 104, 96>}]} {
    %c0 = arith.constant 0 : index
    %c0_0 = arith.constant 0 : index
    %0 = vector.load %arg1[%c0, %c0_0] : memref<104x384xbf16, #tpu.memory_space<vmem>>, vector<104x384xbf16>
    %c0_1 = arith.constant 0 : index
    %c0_2 = arith.constant 0 : index
    %1 = vector.load %arg2[%c0_1, %c0_2] : memref<384x96xbf16, #tpu.memory_space<vmem>>, vector<384x96xbf16>
    %cst = arith.constant dense<0.000000e+00> : vector<104x96xf32>
    %2 = tpu.matmul %0, %1, %cst {dimension_numbers = #tpu.dot_dimension_numbers<[1], [0], [0], [1], [0, 0, 1, 1], [], []>} : vector<104x384xbf16>, vector<384x96xbf16>, vector<104x96xf32> -> vector<104x96xf32>
    %c0_3 = arith.constant 0 : index
    %c0_4 = arith.constant 0 : index
    %3 = vector.load %arg3[%c0_3, %c0_4] : memref<1x96xf32, #tpu.memory_space<vmem>>, vector<1x96xf32>
    %4 = vector.broadcast %3 : vector<1x96xf32> to vector<104x96xf32>
    %5 = arith.addf %2, %4 : vector<104x96xf32>
    %c0_5 = arith.constant 0 : index
    %c0_6 = arith.constant 0 : index
    %6 = vector.load %arg4[%c0_5, %c0_6] : memref<104x96xf32, #tpu.memory_space<vmem>>, vector<104x96xf32>
    tpu.vector_store %arg4[%c0_5, %c0_6], %5 {strides = array<i32>} : memref<104x96xf32, #tpu.memory_space<vmem>>, vector<104x96xf32>,
    return
  }
  func.func @transform_0(%arg0: i32) -> (i32, i32) {
    %c0_i32 = arith.constant 0 : i32
    %c0_i32_0 = arith.constant 0 : i32
    return %arg0, %c0_i32 : i32, i32
  }
  func.func @transform_1(%arg0: i32) -> (i32, i32) {
    %c0_i32 = arith.constant 0 : i32
    %c0_i32_0 = arith.constant 0 : i32
    %c0_i32_1 = arith.constant 0 : i32
    return %c0_i32, %c0_i32_0 : i32, i32
  }
  func.func @transform_2(%arg0: i32) -> (i32, i32) {
    %c0_i32 = arith.constant 0 : i32
    %c0_i32_0 = arith.constant 0 : i32
    %c0_i32_1 = arith.constant 0 : i32
    return %c0_i32, %c0_i32_0 : i32, i32
  }
  func.func @transform_3(%arg0: i32) -> (i32, i32) {
    %c0_i32 = arith.constant 0 : i32
    %c0_i32_0 = arith.constant 0 : i32
    return %arg0, %c0_i32 : i32, i32
  }
}

</mosaic_0001>

<bundles_post_ra>
// kernel: tpu_custom_call.1
= control target key start
LH: loop header
LB: loop body
LE: loop exit
PB: predicated region body
PF: predicated region fallthrough
CT: control target
= control target key end

     0   :  { %s1396_s12 = smov 0   ;;  %s1398_s13 = smov 0   ;;  %s1725_s0 = inlined_call_operand.vmem [shape: bf16[200,384], index: 0, kind: input, shape index: {}]   ;;  %s1726_s1 = inlined_call_operand.vmem [shape: bf16[384,96], index: 1, kind: input, shape index: {}]   ;;  %s1727_s2 = inlined_call_operand.vmem [shape: f32[1,96], index: 2, kind: input, shape index: {}]   ;;  %s1728_s3 = inlined_call_operand.vmem [shape: f32[200,96], index: 3, kind: output, shape index: {}]  }
   0x1   :  { %s1400_s14 = smov 0  }
   0x2 LB: > { %s1409_s15 = sadd.s32 4294967295, %s1342_s14   ;;  %s1411_s16 = sadd.s32 1, %s1342_s14   ;;  %s1342_s14 = sphi %s1400_s14, %s1737_s14   ;;  %s1338_s13 = sphi %s1398_s13, %s1736_s13   ;;  %s1334_s12 = sphi %s1396_s12, %s1735_s12  }
   0x3   : > { %s85_s17 = ssub.s32 %s1342_s14, %s1411_s16  ;;  %s88_s18 = sadd.s32 1, %s1338_s13 }
   0x4   : > { %p86_p0 = scmp.eq.s32.totalorder %s85_s17, 0  ;;  %p98_p1 = scmp.ne.s32.totalorder %s1338_s13, %s1334_s12 }
   0x5   : > { %p99_p2 = scmp.eq.s32.totalorder %s1409_s15, 1  ;;  %p941_p3 = scmp.ge.s32.totalorder %s1342_s14, 1 }
   0x6   : > { %s1419_s19 = scalar_select %p86_p0, %s1338_s13, %s88_s18  }
   0x7   : > { %p1421_p4 = por %p99_p2, %p98_p1  ;;  %p149_p5 = scmp.lt.s32.totalorder %s1342_s14, 3 }
   0x9   : > { %p150_p6 = pnand %p941_p3, %p149_p5 }
   0xa   : > { %s1457_s8 = smul.u32 (!%p150_p6), 13, %s1409_s15  ;;  %s175_s10 = sand.u32 (!%p150_p6), 1, %s1334_s12  }
   0xb   : > { %153 = sbr.rel (%p150_p6) target bundleno = 330 (0x14a), region = 32 }
   0xc   : > { %p184_p7 = scmp.lt.s32.totalorder (!%p150_p6), %s1457_s8, 24  ;;  %s1190_s11 = smul.u32 (!%p150_p6), 104, %s175_s10 }
   0xe   : > { %s1592_s14 = scalar_lea.vmem (!%p150_p6), [#allocation2], %s1190_s11  }
  0x10   : > { %v1148_v0 = vld [vmem:[%s1726_s1 + $0x38] sm:$0xff]  ;;  %v1147_v3 = vld [vmem:[%s1726_s1 + $0x30] sm:$0xff]  ;;  %v1146_v6 = vld [vmem:[%s1726_s1 + $0x28] sm:$0xff]  ;;  %s185_s27 = scalar_select %p184_p7, %s1457_s8, 24  ;;  %vm658_vm0 = vcmask 785408  }
  0x11   : > { %v1431_v1 = vld [vmem:[%s1726_s1 + $0x78] sm:$0xff]  ;;  %529 = vmatpush.bf16.msra.mxu0 %v1148_v0  ;;  %1166 = vmatpush.bf16.msra.mxu3 %v1148_v0  ;;  %v1446_v4 = vld [vmem:[%s1726_s1 + $0x70] sm:$0xff]  ;;  %v1154_v7 = vld [vmem:[%s1726_s1 + $0x68] sm:$0xff]  ;;  %s680_s12 = ssub.s32 (%p1421_p4), 25, %s1457_s8  ;;  %s1165_s17 = smul.u32 (%p1421_p4), 104, %s1409_s15 }
  0x12   : > { %v1436_v2 = vld [vmem:[%s1726_s1 + $0xb8] sm:$0xff]  ;;  %1174 = vmatpush.bf16.msra.mxu1 %v1431_v1  ;;  %v1451_v5 = vld [vmem:[%s1726_s1 + $0xb0] sm:$0xff]  ;;  %v1467_v8 = vld [vmem:[%s1726_s1 + $0xa8] sm:$0xff]  ;;  %s1191_s7 = smul.u32 12, %s185_s27  ;;  %p681_p8 = scmp.lt.s32.totalorder (%p1421_p4), %s680_s12, 13 }
  0x13   : > { %1182 = vmatpush.bf16.msra.mxu2 %v1436_v2  ;;  %v1145_v9 = vld [vmem:[%s1726_s1 + $0x20] sm:$0xff]  ;;  %v1144_v12 = vld [vmem:[%s1726_s1 + $0x18] sm:$0xff]  ;;  %v1143_v15 = vld [vmem:[%s1726_s1 + $0x10] sm:$0xff]  ;;  %s1639_s22 = scalar_lea.vmem (%p1421_p4), %s1728_s3, %s1165_s17  }
  0x14   : > { %v1153_v10 = vld [vmem:[%s1726_s1 + $0x60] sm:$0xff]  ;;  %v1152_v13 = vld [vmem:[%s1726_s1 + $0x58] sm:$0xff]  ;;  %v1151_v16 = vld [vmem:[%s1726_s1 + $0x50] sm:$0xff]  ;;  %s1513_s23 = scalar_lea.vmem %s1725_s0, %s1191_s7 }
  0x15   : > { %530 = vmatpush.bf16.msra.mxu0 %v1147_v3  ;;  %1167 = vmatpush.bf16.msra.mxu3 %v1147_v3  ;;  %v1480_v11 = vld [vmem:[%s1726_s1 + $0xa0] sm:$0xff]  ;;  %v1493_v14 = vld [vmem:[%s1726_s1 + $0x98] sm:$0xff]  ;;  %v1505_v17 = vld [vmem:[%s1726_s1 + $0x90] sm:$0xff] }
  0x16   : > { %1175 = vmatpush.bf16.msra.mxu1 %v1446_v4  ;;  %v1142_v18 = vld [vmem:[%s1726_s1 + $0x8] sm:$0xff]  ;;  %v1141_v21 = vld [vmem:[%s1726_s1] sm:$0xff]  ;;  %v957_v24 = vld [vmem:[%s1513_s23 + $0x18] sm:$0xf] }
  0x17   : > { %1183 = vmatpush.bf16.msra.mxu2 %v1451_v5  ;;  %v1150_v19 = vld [vmem:[%s1726_s1 + $0x48] sm:$0xff]  ;;  %v1149_v22 = vld [vmem:[%s1726_s1 + $0x40] sm:$0xff]  ;;  %v1126_v26 = vld [vmem:[%s1513_s23 + $0x1c] sm:$0xf] }
  0x18   : > { %v1522_v20 = vld [vmem:[%s1726_s1 + $0x88] sm:$0xff]  ;;  %v1533_v23 = vld [vmem:[%s1726_s1 + $0x80] sm:$0xff]  ;;  %v969_v36 = vld [vmem:[%s1513_s23 + $0x30] sm:$0xf] }
  0x19   : > { %531 = vmatpush.bf16.msra.mxu0 %v1146_v6  ;;  %1168 = vmatpush.bf16.msra.mxu3 %v1146_v6  ;;  %v1127_v25 = vld [vmem:[%s1513_s23 + $0x20] sm:$0xf0]  ;;  %v945_v27 = vld [vmem:[%s1513_s23] sm:$0xf]  ;;  %v1124_v28 = vld [vmem:[%s1513_s23 + $0x8] sm:$0xf0] }
  0x1a   : > { %1176 = vmatpush.bf16.msra.mxu1 %v1154_v7  ;;  %v959_v29 = vld [vmem:[%s1513_s23 + $0x24] sm:$0xf0]  ;;  %v965_v30 = vld [vmem:[%s1513_s23 + $0x20] sm:$0xf]  ;;  %v1128_v31 = vld [vmem:[%s1513_s23 + $0x28] sm:$0xf0]  ;;  %v958_v32 = vor.u32 %v1127_v25, %v957_v24  ;;  %v946_v33 = vor.u32 %v1124_v28, %v945_v27 }
  0x1b   : > { %1184 = vmatpush.bf16.msra.mxu2 %v1467_v8  ;;  %v962_v34 = vor.u32 %v1126_v26, %v959_v29  ;;  %v966_v35 = vor.u32 %v1128_v31, %v965_v30  ;;  %v1130_v37 = vld [vmem:[%s1513_s23 + $0x38] sm:$0xf0]  ;;  %v1129_v38 = vld [vmem:[%s1513_s23 + $0x34] sm:$0xf]  ;;  %v971_v39 = vld [vmem:[%s1513_s23 + $0x3c] sm:$0xf0] }
  0x1c   : > { %v977_v40 = vld [vmem:[%s1513_s23 + $0x38] sm:$0xf]  ;;  %v1131_v41 = vld [vmem:[%s1513_s23 + $0x40] sm:$0xf0]  ;;  %v970_v42 = vor.u32 %v1130_v37, %v969_v36  ;;  %v974_v43 = vor.u32 %v1129_v38, %v971_v39  ;;  %v947_v46 = vld [vmem:[%s1513_s23 + $0xc] sm:$0xf0] }
  0x1d   : > { %532 = vmatpush.bf16.msra.mxu0 %v1145_v9  ;;  %1169 = vmatpush.bf16.msra.mxu3 %v1145_v9  ;;  %v978_v44 = vor.u32 %v1131_v41, %v977_v40  ;;  %v1123_v45 = vld [vmem:[%s1513_s23 + $0x4] sm:$0xf]  ;;  %v981_v47 = vld [vmem:[%s1513_s23 + $0x48] sm:$0xf]  ;;  %v1133_v48 = vld [vmem:[%s1513_s23 + $0x50] sm:$0xf0] }
  0x1e   : > { %1177 = vmatpush.bf16.msra.mxu1 %v1153_v10  ;;  %v1132_v49 = vld [vmem:[%s1513_s23 + $0x4c] sm:$0xf]  ;;  %v983_v50 = vld [vmem:[%s1513_s23 + $0x54] sm:$0xf0]  ;;  %v989_v51 = vld [vmem:[%s1513_s23 + $0x50] sm:$0xf]  ;;  %v950_v53 = vor.u32 %v1123_v45, %v947_v46  ;;  %v982_v54 = vor.u32 %v1133_v48, %v981_v47 }
  0x1f   : > { %1185 = vmatpush.bf16.msra.mxu2 %v1480_v11  ;;  %v1134_v52 = vld [vmem:[%s1513_s23 + $0x58] sm:$0xf0]  ;;  %v986_v55 = vor.u32 %v1132_v49, %v983_v50  ;;  %v993_v57 = vld [vmem:[%s1513_s23 + $0x60] sm:$0xf]  ;;  %v1136_v58 = vld [vmem:[%s1513_s23 + $0x68] sm:$0xf0] }
  0x20   : > { %v990_v56 = vor.u32 %v1134_v52, %v989_v51  ;;  %v1135_v59 = vld [vmem:[%s1513_s23 + $0x64] sm:$0xf]  ;;  %v995_v60 = vld [vmem:[%s1513_s23 + $0x6c] sm:$0xf0]  ;;  %v1001_v61 = vld [vmem:[%s1513_s23 + $0x68] sm:$0xf]  ;;  %v994_v63 = vor.u32 %v1136_v58, %v993_v57 }
  0x21   : > { %533 = vmatpush.bf16.msra.mxu0 %v1144_v12  ;;  %1170 = vmatpush.bf16.msra.mxu3 %v1144_v12  ;;  %v1137_v62 = vld [vmem:[%s1513_s23 + $0x70] sm:$0xf0]  ;;  %v998_v0 = vor.u32 %v1135_v59, %v995_v60  ;;  %v1139_v6 = vld [vmem:[%s1513_s23 + $0x80] sm:$0xf0]  ;;  %v1013_v9 = vld [vmem:[%s1513_s23 + $0x80] sm:$0xf] }
  0x22   : > { %1178 = vmatpush.bf16.msra.mxu1 %v1152_v13  ;;  %v1125_v3 = vld [vmem:[%s1513_s23 + $0x10] sm:$0xf0] }
  0x23   : > { %1186 = vmatpush.bf16.msra.mxu2 %v1493_v14 }
  0x25   : > { %534 = vmatpush.bf16.msra.mxu0 %v1143_v15  ;;  %1171 = vmatpush.bf16.msra.mxu3 %v1143_v15  ;;  %v225_v15 = vld [vmem:[%s1513_s23 + $0x98] sm:$0xf] }
  0x26   : > { %1179 = vmatpush.bf16.msra.mxu1 %v1151_v16 }
  0x27   : > { %1187 = vmatpush.bf16.msra.mxu2 %v1505_v17 }
  0x29   : > { %535 = vmatpush.bf16.msra.mxu0 %v1142_v18  ;;  %1172 = vmatpush.bf16.msra.mxu3 %v1142_v18  ;;  %v342_v18 = vunpack.c.l.b16 %v225_v15 }
  0x2a   : > { %1180 = vmatpush.bf16.msra.mxu1 %v1150_v19 }
  0x2b   : > { %1188 = vmatpush.bf16.msra.mxu2 %v1522_v20 }
  0x2d   : > { %536 = vmatpush.bf16.msra.mxu0 %v1141_v21  ;;  %1173 = vmatpush.bf16.msra.mxu3 %v1141_v21  ;;  %v363_v21 = vpack.c.b16 %v342_v18, %v342_v18 }
  0x2e   : > { %1181 = vmatpush.bf16.msra.mxu1 %v1149_v22 }
  0x2f   : > { %1189 = vmatpush.bf16.msra.mxu2 %v1533_v23 }
  0x30   : > { %542 = vmatmul.bf16.vlgmr.msra.gmra.mxu3 %v958_v32  ;;  %537 = vmatmul.bf16.vlgmr.msra.gmra.mxu0 %v946_v33 }
  0x31   : > { %572 = vmatpush.bf16.msrb.mxu0 %v1431_v1  ;;  %585 = vmatmul.bf16.vlgmr.msra.gmra.mxu1 %v962_v34  ;;  %v1002_v1 = vor.u32 %v1137_v62, %v1001_v61 }
  0x32   : > { %628 = vmatmul.bf16.vlgmr.msra.gmra.mxu2 %v966_v35 }
  0x35   : > { %573 = vmatpush.bf16.msrb.mxu0 %v1446_v4 }
  0x39   : > { %574 = vmatpush.bf16.msrb.mxu0 %v1154_v7  ;;  %v1138_v7 = vld [vmem:[%s1513_s23 + $0x7c] sm:$0xf] }
  0x3d   : > { %575 = vmatpush.bf16.msrb.mxu0 %v1153_v10  ;;  %v1140_v10 = vld [vmem:[%s1513_s23 + $0x88] sm:$0xf0] }
  0x40   : > { %547 = vmatmul.bf16.gmra.mxu3 %v970_v42 }
  0x41   : > { %576 = vmatpush.bf16.msrb.mxu0 %v1152_v13  ;;  %590 = vmatmul.bf16.gmra.mxu1 %v974_v43  ;;  %v1014_v13 = vor.u32 %v1140_v10, %v1013_v9 }
  0x42   : > { %633 = vmatmul.bf16.gmra.mxu2 %v978_v44 }
  0x45   : > { %577 = vmatpush.bf16.msrb.mxu0 %v1151_v16 }
  0x49   : > { %578 = vmatpush.bf16.msrb.mxu0 %v1150_v19 }
  0x4d   : > { %579 = vmatpush.bf16.msrb.mxu0 %v1149_v22 }
  0x50   : > { %580 = vmatmul.bf16.vlgmr.msrb.gmra.mxu0 %v950_v53  ;;  %552 = vmatmul.bf16.gmra.mxu3 %v982_v54 }
  0x51   : > { %615 = vmatpush.bf16.msra.mxu0 %v1436_v2  ;;  %595 = vmatmul.bf16.gmra.mxu1 %v986_v55  ;;  %v953_v2 = vld [vmem:[%s1513_s23 + $0x8] sm:$0xf] }
  0x52   : > { %638 = vmatmul.bf16.gmra.mxu2 %v990_v56  ;;  %v954_v4 = vor.u32 %v1125_v3, %v953_v2 }
  0x55   : > { %616 = vmatpush.bf16.msra.mxu0 %v1451_v5  ;;  %v1005_v5 = vld [vmem:[%s1513_s23 + $0x78] sm:$0xf] }
  0x59   : > { %617 = vmatpush.bf16.msra.mxu0 %v1467_v8  ;;  %v1007_v8 = vld [vmem:[%s1513_s23 + $0x84] sm:$0xf0] }
  0x5a   : > { %v1010_v12 = vor.u32 %v1138_v7, %v1007_v8 }
  0x5d   : > { %618 = vmatpush.bf16.msra.mxu0 %v1480_v11  ;;  %v1006_v11 = vor.u32 %v1139_v6, %v1005_v5 }
  0x60   : > { %557 = vmatmul.bf16.gmra.mxu3 %v994_v63 }
  0x61   : > { %619 = vmatpush.bf16.msra.mxu0 %v1493_v14  ;;  %600 = vmatmul.bf16.gmra.mxu1 %v998_v0  ;;  %v224_v14 = vld [vmem:[%s1513_s23 + $0x90] sm:$0xff] }
  0x62   : > { %643 = vmatmul.bf16.gmra.mxu2 %v1002_v1  ;;  %v340_v16 = vunpack.c.l.b16 %v224_v14 }
  0x64   : > { %v361_v19 = vpack.c.b16 %v340_v16, %v340_v16 }
  0x65   : > { %620 = vmatpush.bf16.msra.mxu0 %v1505_v17  ;;  %v341_v17 = vunpack.c.h.b16 %v224_v14 }
  0x69   : > { %621 = vmatpush.bf16.msra.mxu0 %v1522_v20  ;;  %v362_v20 = vpack.c.b16 %v341_v17, %v341_v17 }
  0x6d   : > { %622 = vmatpush.bf16.msra.mxu0 %v1533_v23  ;;  %v1588_v23 = vld [vmem:[%s1727_s2] ss:$0 sm:$0xff] }
  0x70   : > { %623 = vmatmul.bf16.vlgmr.msra.gmra.mxu0 %v954_v4  ;;  %562 = vmatmul.bf16.gmra.mxu3 %v1006_v11 }
  0x71   : > { %605 = vmatmul.bf16.gmra.mxu1 %v1010_v12 }
  0x72   : > { %648 = vmatmul.bf16.gmra.mxu2 %v1014_v13 }
  0x80   : > { %567 = vmatmul.bf16.gmra.mxu3 %v361_v19 }
  0x81   : > { %610 = vmatmul.bf16.gmra.mxu1 %v362_v20 }
  0x82   : > { %653 = vmatmul.bf16.gmra.mxu2 %v363_v21 }
  0xad   : > { %v538_v36 = vpop.f32.mrf.mxu0 }
  0xae   : > { %v586_v22 = vpop.f32.mrf.mxu1  ;;  %v539_v0 = vadd.f32 %v1588_v23, %v538_v36 }
  0xb3   : > { %v543_v24 = vpop.f32.mrf.mxu3 }
  0xb4   : > { %v544_v25 = vadd.f32 %v1588_v23, %v543_v24 }
  0xb5   : > { %v629_v26 = vpop.f32.mrf.mxu2  ;;  %v540_v43 = vpop.f32.mrf.mxu0 }
  0xb6   : > { %v587_v27 = vadd.f32 %v586_v22, %v544_v25  ;;  %v588_v28 = vpop.f32.mrf.mxu1  ;;  %v541_v10 = vadd.f32 %v1588_v23, %v540_v43 }
  0xb8   : > { %v630_v29 = vadd.f32 %v629_v26, %v587_v27 }
  0xba   : > { %661 = vst.msk [vmem:[%s1592_s14 + $0x10] sm:$0xff] %vm658_vm0, %v630_v29 }
  0xbb   : > { %v545_v30 = vpop.f32.mrf.mxu3 }
  0xbc   : > { %v546_v31 = vadd.f32 %v1588_v23, %v545_v30 }
  0xbd   : > { %v631_v32 = vpop.f32.mrf.mxu2 }
  0xbe   : > { %v589_v33 = vadd.f32 %v588_v28, %v546_v31  ;;  %v591_v34 = vpop.f32.mrf.mxu1 }
  0xc0   : > { %v632_v35 = vadd.f32 %v631_v32, %v589_v33 }
  0xc2   : > { %662 = vst.msk [vmem:[%s1592_s14 + $0x18] sm:$0xff] %vm658_vm0, %v632_v35 }
  0xc3   : > { %v548_v37 = vpop.f32.mrf.mxu3 }
  0xc4   : > { %v549_v38 = vadd.f32 %v1588_v23, %v548_v37 }
  0xc5   : > { %v634_v39 = vpop.f32.mrf.mxu2 }
  0xc6   : > { %v592_v40 = vadd.f32 %v591_v34, %v549_v38  ;;  %v593_v41 = vpop.f32.mrf.mxu1 }
  0xc8   : > { %v635_v42 = vadd.f32 %v634_v39, %v592_v40 }
  0xca   : > { %663 = vst.msk [vmem:[%s1592_s14 + $0x20] sm:$0xff] %vm658_vm0, %v635_v42 }
  0xcb   : > { %v550_v44 = vpop.f32.mrf.mxu3 }
  0xcc   : > { %v551_v45 = vadd.f32 %v1588_v23, %v550_v44 }
  0xcd   : > { %v636_v46 = vpop.f32.mrf.mxu2  ;;  %v581_v53 = vpop.f32.mrf.mxu0 }
  0xce   : > { %v594_v47 = vadd.f32 %v593_v41, %v551_v45  ;;  %v596_v48 = vpop.f32.mrf.mxu1  ;;  %v582_v6 = vadd.f32 %v581_v53, %v539_v0 }
  0xd0   : > { %v637_v49 = vadd.f32 %v636_v46, %v594_v47 }
  0xd2   : > { %664 = vst.msk [vmem:[%s1592_s14 + $0x28] sm:$0xff] %vm658_vm0, %v637_v49 }
  0xd3   : > { %v553_v50 = vpop.f32.mrf.mxu3 }
  0xd4   : > { %v554_v51 = vadd.f32 %v1588_v23, %v553_v50 }
  0xd5   : > { %v639_v52 = vpop.f32.mrf.mxu2  ;;  %v583_v62 = vpop.f32.mrf.mxu0 }
  0xd6   : > { %v597_v54 = vadd.f32 %v596_v48, %v554_v51  ;;  %v598_v55 = vpop.f32.mrf.mxu1  ;;  %v584_v16 = vadd.f32 %v583_v62, %v541_v10 }
  0xd8   : > { %v640_v56 = vadd.f32 %v639_v52, %v597_v54 }
  0xda   : > { %665 = vst.msk [vmem:[%s1592_s14 + $0x30] sm:$0xff] %vm658_vm0, %v640_v56 }
  0xdb   : > { %v555_v57 = vpop.f32.mrf.mxu3 }
  0xdc   : > { %v556_v58 = vadd.f32 %v1588_v23, %v555_v57 }
  0xdd   : > { %v641_v59 = vpop.f32.mrf.mxu2 }
  0xde   : > { %v599_v60 = vadd.f32 %v598_v55, %v556_v58  ;;  %v601_v61 = vpop.f32.mrf.mxu1 }
  0xe0   : > { %v642_v63 = vadd.f32 %v641_v59, %v599_v60 }
  0xe2   : > { %666 = vst.msk [vmem:[%s1592_s14 + $0x38] sm:$0xff] %vm658_vm0, %v642_v63 }
  0xe3   : > { %v558_v1 = vpop.f32.mrf.mxu3 }
  0xe4   : > { %v559_v2 = vadd.f32 %v1588_v23, %v558_v1 }
  0xe5   : > { %v644_v3 = vpop.f32.mrf.mxu2 }
  0xe6   : > { %v602_v4 = vadd.f32 %v601_v61, %v559_v2  ;;  %v603_v5 = vpop.f32.mrf.mxu1 }
  0xe8   : > { %v645_v7 = vadd.f32 %v644_v3, %v602_v4 }
  0xea   : > { %667 = vst.msk [vmem:[%s1592_s14 + $0x40] sm:$0xff] %vm658_vm0, %v645_v7 }
  0xeb   : > { %v560_v11 = vpop.f32.mrf.mxu3 }
  0xec   : > { %v561_v12 = vadd.f32 %v1588_v23, %v560_v11 }
  0xed   : > { %v624_v8 = vpop.f32.mrf.mxu0  ;;  %v646_v13 = vpop.f32.mrf.mxu2 }
  0xee   : > { %v625_v9 = vadd.f32 %v624_v8, %v582_v6  ;;  %v604_v14 = vadd.f32 %v603_v5, %v561_v12  ;;  %v606_v15 = vpop.f32.mrf.mxu1 }
  0xf0   : > { %659 = vst.msk [vmem:[%s1592_s14] sm:$0xff] %vm658_vm0, %v625_v9  ;;  %v647_v17 = vadd.f32 %v646_v13, %v604_v14 }
  0xf2   : > { %668 = vst.msk [vmem:[%s1592_s14 + $0x48] sm:$0xff] %vm658_vm0, %v647_v17 }
  0xf3   : > { %v563_v20 = vpop.f32.mrf.mxu3 }
  0xf4   : > { %v564_v21 = vadd.f32 %v1588_v23, %v563_v20 }
  0xf5   : > { %v626_v18 = vpop.f32.mrf.mxu0  ;;  %v649_v22 = vpop.f32.mrf.mxu2 }
  0xf6   : > { %v627_v19 = vadd.f32 %v626_v18, %v584_v16  ;;  %v607_v24 = vadd.f32 %v606_v15, %v564_v21  ;;  %v608_v25 = vpop.f32.mrf.mxu1 }
  0xf8   : > { %660 = vst.msk [vmem:[%s1592_s14 + $0x8] sm:$0xff] %vm658_vm0, %v627_v19  ;;  %v650_v26 = vadd.f32 %v649_v22, %v607_v24 }
  0xfa   : > { %669 = vst.msk [vmem:[%s1592_s14 + $0x50] sm:$0xff] %vm658_vm0, %v650_v26 }
  0xfb   : > { %v565_v27 = vpop.f32.mrf.mxu3 }
  0xfc   : > { %v566_v28 = vadd.f32 %v1588_v23, %v565_v27 }
  0xfd   : > { %v651_v29 = vpop.f32.mrf.mxu2 }
  0xfe   : > { %v609_v30 = vadd.f32 %v608_v25, %v566_v28  ;;  %v611_v31 = vpop.f32.mrf.mxu1 }
 0x100   : > { %v652_v32 = vadd.f32 %v651_v29, %v609_v30 }
 0x102   : > { %670 = vst.msk [vmem:[%s1592_s14 + $0x58] sm:$0xff] %vm658_vm0, %v652_v32 }
 0x103   : > { %v568_v33 = vpop.f32.mrf.mxu3 }
 0x104   : > { %v569_v34 = vadd.f32 %v1588_v23, %v568_v33 }
 0x105   : > { %v654_v35 = vpop.f32.mrf.mxu2 }
 0x106   : > { %v612_v36 = vadd.f32 %v611_v31, %v569_v34  ;;  %v613_v37 = vpop.f32.mrf.mxu1 }
 0x108   : > { %v655_v38 = vadd.f32 %v654_v35, %v612_v36 }
 0x109   : > { %678 = sbr.rel (!%p1421_p4) target bundleno = 330 (0x14a), region = 36 }
 0x10a   : > { %671 = vst.msk [vmem:[%s1592_s14 + $0x60] sm:$0xff] %vm658_vm0, %v655_v38 }
 0x10b   : > { %v570_v39 = vpop.f32.mrf.mxu3 }
 0x10d   : > { %v656_v40 = vpop.f32.mrf.mxu2 }
 0x10e   : > { %s1739_s12 = smov (!%p681_p8, %s680_s12), 13 }
 0x10f   : > { %s1111_s23 = sshll.u32 %s1739_s12, 3 }
 0x110   : > { %p1114_p9 = scmp.eq.s32.totalorder %s1111_s23, 0 }
 0x111   : > { %1282 = sdivrem.u32 (!%p1114_p9), %s1739_s12, 13 }
 0x112   : > { %689 = sbr.rel (%p1114_p9) target bundleno = 330 (0x14a), region = 40 }
 0x11a   : > { %s1645_s20 = spop.drf %1282 }
 0x11b   : > { %s1284_s24 = spop.drf %1282  ;;  %p1115_p10 = scmp.le.s32.totalorder %s1645_s20, 0 }
 0x11c   : > { %s1730_s15 = smov (!%p1115_p10), %s1639_s22  ;;  %s1731_s8 = smov (!%p1115_p10), %s1592_s14 }
 0x11d   : > { %894 = sbr.rel (%p1115_p10) target bundleno = 304 (0x130), region = 116  ;;  %s1654_s25 = smov (!%p1115_p10), 0  }
 0x11e   : > { %s1656_s26 = smov (!%p1115_p10), 0  }
 0x122 LB: >> { %v778_v23 = vld [vmem:[%s1350_s8] sm:$0xff]  ;;  %v780_v41 = vld [vmem:[%s1350_s8 + $0x8] sm:$0xff]  ;;  %v782_v42 = vld [vmem:[%s1350_s8 + $0x10] sm:$0xff]  ;;  %s804_s27 = sadd.s32 1, %s1354_s25  ;;  %s772_s26 = sadd.s32 1, %s1358_s26   ;;  %s1358_s26 = sphi %s1656_s26, %s772_s26   ;;  %s1354_s25 = sphi %s1654_s25, %s1734_s25   ;;  %s1350_s8 = sphi %s1731_s8, %s1733_s8   ;;  %s1346_s15 = sphi %s1730_s15, %s1732_s15  }
 0x123   : >> { %779 = vst [vmem:[%s1346_s15] sm:$0xff] %v778_v23  ;;  %v784_v43 = vld [vmem:[%s1350_s8 + $0x18] sm:$0xff]  ;;  %p805_p11 = scmp.ge.s32.totalorder %s804_s27, %s1645_s20  ;;  %v786_v44 = vld [vmem:[%s1350_s8 + $0x20] sm:$0xff]  ;;  %v788_v45 = vld [vmem:[%s1350_s8 + $0x28] sm:$0xff]  ;;  %p771_p12 = scmp.ge.s32.totalorder %s772_s26, %s1645_s20 }
 0x124   : >> { %781 = vst [vmem:[%s1346_s15 + $0x8] sm:$0xff] %v780_v41  ;;  %v790_v46 = vld [vmem:[%s1350_s8 + $0x30] sm:$0xff]  ;;  %v792_v47 = vld [vmem:[%s1350_s8 + $0x38] sm:$0xff]  ;;  %v794_v48 = vld [vmem:[%s1350_s8 + $0x40] sm:$0xff] }
 0x125   : >> { %783 = vst [vmem:[%s1346_s15 + $0x10] sm:$0xff] %v782_v42  ;;  %s1741_s27 = smov (%p805_p11, %s804_s27), 0  ;;  %v796_v49 = vld [vmem:[%s1350_s8 + $0x48] sm:$0xff]  ;;  %v798_v50 = vld [vmem:[%s1350_s8 + $0x50] sm:$0xff]  ;;  %v800_v51 = vld [vmem:[%s1350_s8 + $0x58] sm:$0xff] }
 0x126   : >> { %785 = vst [vmem:[%s1346_s15 + $0x18] sm:$0xff] %v784_v43  ;;  %s807_s28 = smul.u32 104, %s1741_s27  ;;  %v802_v52 = vld [vmem:[%s1350_s8 + $0x60] sm:$0xff]  ;;  %s1734_s25 = smov %s1741_s27 }
 0x127   : >> { %787 = vst [vmem:[%s1346_s15 + $0x20] sm:$0xff] %v786_v44 }
 0x128   : >> { %789 = vst [vmem:[%s1346_s15 + $0x28] sm:$0xff] %v788_v45  ;;  %s809_s29 = scalar_lea.vmem %s1592_s14, %s807_s28 [#allocation2]   ;;  %s810_s30 = scalar_lea.vmem %s1639_s22, %s807_s28  }
 0x129   : >> { %791 = vst [vmem:[%s1346_s15 + $0x30] sm:$0xff] %v790_v46  ;;  %s1733_s8 = smov %s809_s29 }
 0x12a   : >> { %793 = vst [vmem:[%s1346_s15 + $0x38] sm:$0xff] %v792_v47 }
 0x12b   : >> { %795 = vst [vmem:[%s1346_s15 + $0x40] sm:$0xff] %v794_v48  ;;  %774 = sbr.rel (!%p771_p12) target bundleno = 290 (0x122), region = 122 }
 0x12c   : >> { %797 = vst [vmem:[%s1346_s15 + $0x48] sm:$0xff] %v796_v49 }
 0x12d   : >> { %799 = vst [vmem:[%s1346_s15 + $0x50] sm:$0xff] %v798_v50 }
 0x12e   : >> { %801 = vst [vmem:[%s1346_s15 + $0x58] sm:$0xff] %v800_v51 }
 0x12f   : >> { %803 = vst [vmem:[%s1346_s15 + $0x60] sm:$0xff] %v802_v52  ;;  %s1732_s15 = smov %s810_s30 }
 0x130 PF: > { %1285 = sdivrem.u32 %s1739_s12, 13 }
 0x131   : > { %s1116_s4 = smul.u32 104, %s1645_s20 }
 0x133   : > { %s1710_s5 = scalar_lea.vmem %s1592_s14, %s1116_s4 [#allocation2]   ;;  %s817_s6 = scalar_lea.vmem %s1639_s22, %s1116_s4  }
 0x139   : > { %s1286_s7 = spop.drf %1285 }
 0x13a   : > { %s1287_s9 = spop.drf %1285 }
 0x13b   : > { %p1118_p13 = scmp.le.s32.totalorder %s1287_s9, 0 }
 0x13c   : > { %s1360_s10 = smov (!%p1118_p13), %s817_s6   ;;  %s1364_s11 = smov (!%p1118_p13), %s1710_s5  }
 0x13d   : > { %908 = sbr.rel (%p1118_p13) target bundleno = 330 (0x14a), region = 127  ;;  %s1368_s17 = smov (!%p1118_p13), 0  }
 0x13e   : > { %s1372_s18 = smov (!%p1118_p13), 0  }
 0x142 LB: >> { %v827_v53 = vld [vmem:[%s1366_s11] sm:$0xff]  ;;  %s829_s14 = sadd.s32 1, %s1370_s17  ;;  %s821_s18 = sadd.s32 1, %s1374_s18   ;;  %s1374_s18 = sphi %s1372_s18, %s821_s18   ;;  %s1370_s17 = sphi %s1368_s17, %s1369_s17   ;;  %s1366_s11 = sphi %s1364_s11, %s834_s11   ;;  %s1362_s10 = sphi %s1360_s10, %s835_s10  }
 0x143   : >> { %828 = vst [vmem:[%s1362_s10] sm:$0xff] %v827_v53  ;;  %p830_p0 = scmp.ge.s32.totalorder %s829_s14, %s1287_s9  ;;  %p820_p1 = scmp.ge.s32.totalorder %s821_s18, %s1287_s9 }
 0x145   : >> { %s1743_s14 = smov (%p830_p0, %s829_s14), 0  ;;  %823 = sbr.rel (!%p820_p1) target bundleno = 322 (0x142), region = 133 }
 0x146   : >> { %s1119_s12 = sshll.u32 %s1743_s14, 3  ;;  %s1369_s17 = smov %s1743_s14  }
 0x147   : >> { %s834_s11 = scalar_lea.vmem %s1710_s5, %s1119_s12 [#allocation2]   ;;  %s835_s10 = scalar_lea.vmem %s817_s6, %s1119_s12  }
 0x14a PF: > { %p10_p2 = scmp.ge.s32.totalorder %s1411_s16, 4   ;;  %s1735_s12 = smov %s1338_s13 }
 0x14b   : > { %s1736_s13 = smov %s1419_s19  ;;  %s1737_s14 = smov %s1411_s16 }
 0x14c   :  { %12 = sbr.rel (!%p10_p2) target bundleno = 2 (0x2), region = 144 }

</bundles_post_ra>
